<compile_context>
chip_gen: v7x
topology: tpu7x:2x2x1
jax: 0.10.0
libtpu: 0.0.40
codegen_flags: <defaults>
</compile_context>

<pallas_src>
import jax
import jax.numpy as jnp
from jax import lax
from jax.experimental import pallas as pl
from jax.experimental.pallas import tpu as pltpu


_SELECT_GATHER_MAX_VOCAB = 64


def _gather_rows(tbl_ref, idx_col):
    """Vectorized gather tbl_ref[idx_col[i, 0], :] for every row i.

    tbl_ref : [V, D] Ref (VMEM-resident table)
    idx_col : [tb, 1] int32
    returns : [tb, D] float32
    """
    v_size, d = tbl_ref.shape
    tb = idx_col.shape[0]
    if v_size <= _SELECT_GATHER_MAX_VOCAB:
        # Select-accumulate over the tiny vocab: whole-vreg VALU work, dense
        # results, no scalar-driven dynamic slices on the store path.
        acc = jnp.zeros((tb, d), jnp.float32)
        for v in range(v_size):
            row = tbl_ref[pl.ds(v, 1), :]                       # [1, D] static slice
            acc = acc + jnp.where(idx_col == v, row, 0.0).astype(jnp.float32)
        return acc
    # Larger vocab: one-hot matmul on the MXU.
    # TODO(synk): for very large tables (esp. v7x's 64 MiB VMEM) keep them in
    # HBM (memory_space=pl.ANY) and DMA-gather rows instead of a [tb, V]
    # one-hot; a pipeline_mode=pl.Buffered(1) hint would also halve the
    # resident tables' footprint.
    iota = lax.broadcasted_iota(jnp.int32, (tb, v_size), 1)
    onehot = (iota == idx_col).astype(tbl_ref.dtype)
    return jnp.dot(onehot, tbl_ref[...], preferred_element_type=jnp.float32)


def _user_embedding_kernel(idx_ref, fans_tbl_ref, avg_tbl_ref, out_ref):
    """One batch block.

    idx_ref      : [tb, 2] int32 VMEM (col 0 = fans idx, col 1 = avgrating idx)
    fans_tbl_ref : [num_fans, D] VMEM (resident across grid steps)
    avg_tbl_ref  : [num_avgrating, D] VMEM (resident across grid steps)
    out_ref      : [tb, 2*D] VMEM block (fans | avgrating, matching torch.cat)
    """
    d = fans_tbl_ref.shape[1]
    idx = idx_ref[...]                                          # [tb, 2] int32
    fans_emb = _gather_rows(fans_tbl_ref, idx[:, 0:1])
    avg_emb = _gather_rows(avg_tbl_ref, idx[:, 1:2])
    out_ref[:, :d] = fans_emb.astype(out_ref.dtype)
    out_ref[:, d:] = avg_emb.astype(out_ref.dtype)


def _round_up(x, m):
    return (x + m - 1) // m * m


def user_embedding_yelp(user_fea, fans_table, avgrating_table, *, block_b=1024):
    """Pallas equivalent of UserEmbeddingYelp.forward.

    user_fea        : [B, 2] integer array
    fans_table      : [num_fans, D]
    avgrating_table : [num_avgrating, D]
    returns         : [B, 2*D] (same dtype as the tables)
    """
    B = user_fea.shape[0]
    num_fans, D = fans_table.shape
    num_avg, D2 = avgrating_table.shape
    assert D2 == D
    out_dtype = fans_table.dtype

    b8 = _round_up(B, 8)
    if b8 < 16:
        # One tiny block covering the exact batch (block dims == array dims):
        # no index padding and no output slicing needed.
        tb, n_blocks, b_pad = B, 1, B
    else:
        tb = min(_round_up(block_b, 8), b8)
        if tb == b8:
            # At least 2 grid steps so v7x's second TensorCore gets work
            # (measured ~0% delta on v5e/v6e, so no downside there).
            tb = _round_up(b8 // 2, 8)
        n_blocks = pl.cdiv(b8, tb)
        b_pad = n_blocks * tb

    idx = user_fea.astype(jnp.int32)
    if b_pad != B:
        idx = jnp.pad(idx, ((0, b_pad - B), (0, 0)))  # padded rows gather row 0

    # Raise the scoped-VMEM limit only if the (double-buffered) resident
    # tables + pipelined blocks would overflow the per-generation defaults.
    itemsize = jnp.dtype(out_dtype).itemsize
    vmem_need = 2 * ((num_fans + num_avg) * D * itemsize       # tables (dbl-buffered)
                     + tb * 2 * D * itemsize                   # output block
                     + tb * 2 * 4) + (2 << 20)                 # idx block + slack
    vmem_limit = None
    if vmem_need > (16 << 20):
        vmem_limit = int(min(vmem_need, 64 << 20))

    grid_spec = pltpu.PrefetchScalarGridSpec(
        num_scalar_prefetch=0,
        grid=(n_blocks,),
        in_specs=[
            pl.BlockSpec((tb, 2), lambda i: (i, 0)),            # per-block indices
            pl.BlockSpec((num_fans, D), lambda i: (0, 0)),      # resident table
            pl.BlockSpec((num_avg, D), lambda i: (0, 0)),       # resident table
        ],
        out_specs=pl.BlockSpec((tb, 2 * D), lambda i: (i, 0)),  # fused output
    )

    out = pl.pallas_call(
        _user_embedding_kernel,
        out_shape=jax.ShapeDtypeStruct((b_pad, 2 * D), out_dtype),
        grid_spec=grid_spec,
        compiler_params=pltpu.CompilerParams(
            dimension_semantics=("parallel",),
            vmem_limit_bytes=vmem_limit),
    )(idx, fans_table, avgrating_table)

    return out if b_pad == B else out[:B]


if __name__ == "__main__":
    # Synthetic config (mirrors config['num_fans'], config['num_avgrating'],
    # config['embedding_dim']).
    num_fans = 8
    num_avgrating = 5
    embedding_dim = 32
    batch = 2

    key = jax.random.PRNGKey(0)
    k_fans, k_avg, k_idx0, k_idx1 = jax.random.split(key, 4)

    # torch.nn.Embedding default init is N(0, 1).
    fans_table = jax.random.normal(k_fans, (num_fans, embedding_dim), jnp.float32)
    avgrating_table = jax.random.normal(
        k_avg, (num_avgrating, embedding_dim), jnp.float32)

    fans_idx = jax.random.randint(k_idx0, (batch,), 0, num_fans, jnp.int32)
    avg_idx = jax.random.randint(k_idx1, (batch,), 0, num_avgrating, jnp.int32)
    user_fea = jnp.stack([fans_idx, avg_idx], axis=1)  # [B, 2]

    out = user_embedding_yelp(user_fea, fans_table, avgrating_table)
    out = jax.block_until_ready(out)

    # Reference check in plain JAX (same semantics as the PyTorch forward).
    ref = jnp.concatenate(
        [fans_table[user_fea[:, 0]], avgrating_table[user_fea[:, 1]]], axis=1)
    assert out.shape == (batch, 2 * embedding_dim)
    assert jnp.allclose(out, ref, atol=1e-6), "mismatch vs reference gather"

    print("KERNEL_OK")
</pallas_src>

<mosaic_0001>
module attributes {stable_mosaic.version = 11 : i64} {
  func.func @_user_embedding_kernel(%arg0: i32, %arg1: memref<2x2xi32, #tpu.memory_space<vmem>>, %arg2: memref<8x32xf32, #tpu.memory_space<vmem>>, %arg3: memref<5x32xf32, #tpu.memory_space<vmem>>, %arg4: memref<2x64xf32, #tpu.memory_space<vmem>>) attributes {dimension_semantics = [#tpu.dimension_semantics<parallel>], iteration_bounds = array<i64: 1>, scalar_prefetch = 0 : i64, scratch_operands = 0 : i64, tpu.core_type = #tpu.core_type<tc>, window_params = [{transform_indices = @transform_0, window_bounds = array<i64: 2, 2>}, {pipeline_mode = #tpu.pipeline_mode<synchronous>, transform_indices = @transform_1, window_bounds = array<i64: 8, 32>}, {pipeline_mode = #tpu.pipeline_mode<synchronous>, transform_indices = @transform_2, window_bounds = array<i64: 5, 32>}, {transform_indices = @transform_3, window_bounds = array<i64: 2, 64>}]} {
    %c0 = arith.constant 0 : index
    %c0_0 = arith.constant 0 : index
    %0 = vector.load %arg1[%c0, %c0_0] : memref<2x2xi32, #tpu.memory_space<vmem>>, vector<2x2xi32>
    %1 = vector.extract_strided_slice %0 {offsets = [0, 0], sizes = [2, 1], strides = [1, 1]} : vector<2x2xi32> to vector<2x1xi32>
    %cst = arith.constant 0.000000e+00 : f32
    %2 = vector.broadcast %cst : f32 to vector<2x32xf32>
    %c0_1 = arith.constant 0 : index
    %c0_2 = arith.constant 0 : index
    %3 = vector.load %arg2[%c0_1, %c0_2] : memref<8x32xf32, #tpu.memory_space<vmem>>, vector<1x32xf32>
    %c0_i32 = arith.constant 0 : i32
    %4 = vector.broadcast %c0_i32 : i32 to vector<2x1xi32>
    %5 = arith.cmpi eq, %1, %4 : vector<2x1xi32>
    %cst_3 = arith.constant 0.000000e+00 : f32
    %6 = vector.shape_cast %5 : vector<2x1xi1> to vector<2x1xi1>
    %7 = vector.broadcast %6 : vector<2x1xi1> to vector<2x32xi1>
    %8 = vector.shape_cast %3 : vector<1x32xf32> to vector<1x32xf32>
    %9 = vector.broadcast %8 : vector<1x32xf32> to vector<2x32xf32>
    %10 = vector.broadcast %cst_3 : f32 to vector<2x32xf32>
    %11 = arith.select %7, %9, %10 : vector<2x32xi1>, vector<2x32xf32>
    %12 = arith.addf %2, %11 : vector<2x32xf32>
    %c1 = arith.constant 1 : index
    %c0_4 = arith.constant 0 : index
    %13 = vector.load %arg2[%c1, %c0_4] : memref<8x32xf32, #tpu.memory_space<vmem>>, vector<1x32xf32>
    %c1_i32 = arith.constant 1 : i32
    %14 = vector.broadcast %c1_i32 : i32 to vector<2x1xi32>
    %15 = arith.cmpi eq, %1, %14 : vector<2x1xi32>
    %cst_5 = arith.constant 0.000000e+00 : f32
    %16 = vector.shape_cast %15 : vector<2x1xi1> to vector<2x1xi1>
    %17 = vector.broadcast %16 : vector<2x1xi1> to vector<2x32xi1>
    %18 = vector.shape_cast %13 : vector<1x32xf32> to vector<1x32xf32>
    %19 = vector.broadcast %18 : vector<1x32xf32> to vector<2x32xf32>
    %20 = vector.broadcast %cst_5 : f32 to vector<2x32xf32>
    %21 = arith.select %17, %19, %20 : vector<2x32xi1>, vector<2x32xf32>
    %22 = arith.addf %12, %21 : vector<2x32xf32>
    %c2 = arith.constant 2 : index
    %c0_6 = arith.constant 0 : index
    %23 = vector.load %arg2[%c2, %c0_6] : memref<8x32xf32, #tpu.memory_space<vmem>>, vector<1x32xf32>
    %c2_i32 = arith.constant 2 : i32
    %24 = vector.broadcast %c2_i32 : i32 to vector<2x1xi32>
    %25 = arith.cmpi eq, %1, %24 : vector<2x1xi32>
    %cst_7 = arith.constant 0.000000e+00 : f32
    %26 = vector.shape_cast %25 : vector<2x1xi1> to vector<2x1xi1>
    %27 = vector.broadcast %26 : vector<2x1xi1> to vector<2x32xi1>
    %28 = vector.shape_cast %23 : vector<1x32xf32> to vector<1x32xf32>
    %29 = vector.broadcast %28 : vector<1x32xf32> to vector<2x32xf32>
    %30 = vector.broadcast %cst_7 : f32 to vector<2x32xf32>
    %31 = arith.select %27, %29, %30 : vector<2x32xi1>, vector<2x32xf32>
    %32 = arith.addf %22, %31 : vector<2x32xf32>
    %c3 = arith.constant 3 : index
    %c0_8 = arith.constant 0 : index
    %33 = vector.load %arg2[%c3, %c0_8] : memref<8x32xf32, #tpu.memory_space<vmem>>, vector<1x32xf32>
    %c3_i32 = arith.constant 3 : i32
    %34 = vector.broadcast %c3_i32 : i32 to vector<2x1xi32>
    %35 = arith.cmpi eq, %1, %34 : vector<2x1xi32>
    %cst_9 = arith.constant 0.000000e+00 : f32
    %36 = vector.shape_cast %35 : vector<2x1xi1> to vector<2x1xi1>
    %37 = vector.broadcast %36 : vector<2x1xi1> to vector<2x32xi1>
    %38 = vector.shape_cast %33 : vector<1x32xf32> to vector<1x32xf32>
    %39 = vector.broadcast %38 : vector<1x32xf32> to vector<2x32xf32>
    %40 = vector.broadcast %cst_9 : f32 to vector<2x32xf32>
    %41 = arith.select %37, %39, %40 : vector<2x32xi1>, vector<2x32xf32>
    %42 = arith.addf %32, %41 : vector<2x32xf32>
    %c4 = arith.constant 4 : index
    %c0_10 = arith.constant 0 : index
    %43 = vector.load %arg2[%c4, %c0_10] : memref<8x32xf32, #tpu.memory_space<vmem>>, vector<1x32xf32>
    %c4_i32 = arith.constant 4 : i32
    %44 = vector.broadcast %c4_i32 : i32 to vector<2x1xi32>
    %45 = arith.cmpi eq, %1, %44 : vector<2x1xi32>
    %cst_11 = arith.constant 0.000000e+00 : f32
    %46 = vector.shape_cast %45 : vector<2x1xi1> to vector<2x1xi1>
    %47 = vector.broadcast %46 : vector<2x1xi1> to vector<2x32xi1>
    %48 = vector.shape_cast %43 : vector<1x32xf32> to vector<1x32xf32>
    %49 = vector.broadcast %48 : vector<1x32xf32> to vector<2x32xf32>
    %50 = vector.broadcast %cst_11 : f32 to vector<2x32xf32>
    %51 = arith.select %47, %49, %50 : vector<2x32xi1>, vector<2x32xf32>
    %52 = arith.addf %42, %51 : vector<2x32xf32>
    %c5 = arith.constant 5 : index
    %c0_12 = arith.constant 0 : index
    %53 = vector.load %arg2[%c5, %c0_12] : memref<8x32xf32, #tpu.memory_space<vmem>>, vector<1x32xf32>
    %c5_i32 = arith.constant 5 : i32
    %54 = vector.broadcast %c5_i32 : i32 to vector<2x1xi32>
    %55 = arith.cmpi eq, %1, %54 : vector<2x1xi32>
    %cst_13 = arith.constant 0.000000e+00 : f32
    %56 = vector.shape_cast %55 : vector<2x1xi1> to vector<2x1xi1>
    %57 = vector.broadcast %56 : vector<2x1xi1> to vector<2x32xi1>
    %58 = vector.shape_cast %53 : vector<1x32xf32> to vector<1x32xf32>
    %59 = vector.broadcast %58 : vector<1x32xf32> to vector<2x32xf32>
    %60 = vector.broadcast %cst_13 : f32 to vector<2x32xf32>
    %61 = arith.select %57, %59, %60 : vector<2x32xi1>, vector<2x32xf32>
    %62 = arith.addf %52, %61 : vector<2x32xf32>
    %c6 = arith.constant 6 : index
    %c0_14 = arith.constant 0 : index
    %63 = vector.load %arg2[%c6, %c0_14] : memref<8x32xf32, #tpu.memory_space<vmem>>, vector<1x32xf32>
    %c6_i32 = arith.constant 6 : i32
    %64 = vector.broadcast %c6_i32 : i32 to vector<2x1xi32>
    %65 = arith.cmpi eq, %1, %64 : vector<2x1xi32>
    %cst_15 = arith.constant 0.000000e+00 : f32
    %66 = vector.shape_cast %65 : vector<2x1xi1> to vector<2x1xi1>
    %67 = vector.broadcast %66 : vector<2x1xi1> to vector<2x32xi1>
    %68 = vector.shape_cast %63 : vector<1x32xf32> to vector<1x32xf32>
    %69 = vector.broadcast %68 : vector<1x32xf32> to vector<2x32xf32>
    %70 = vector.broadcast %cst_15 : f32 to vector<2x32xf32>
    %71 = arith.select %67, %69, %70 : vector<2x32xi1>, vector<2x32xf32>
    %72 = arith.addf %62, %71 : vector<2x32xf32>
    %c7 = arith.constant 7 : index
    %c0_16 = arith.constant 0 : index
    %73 = vector.load %arg2[%c7, %c0_16] : memref<8x32xf32, #tpu.memory_space<vmem>>, vector<1x32xf32>
    %c7_i32 = arith.constant 7 : i32
    %74 = vector.broadcast %c7_i32 : i32 to vector<2x1xi32>
    %75 = arith.cmpi eq, %1, %74 : vector<2x1xi32>
    %cst_17 = arith.constant 0.000000e+00 : f32
    %76 = vector.shape_cast %75 : vector<2x1xi1> to vector<2x1xi1>
    %77 = vector.broadcast %76 : vector<2x1xi1> to vector<2x32xi1>
    %78 = vector.shape_cast %73 : vector<1x32xf32> to vector<1x32xf32>
    %79 = vector.broadcast %78 : vector<1x32xf32> to vector<2x32xf32>
    %80 = vector.broadcast %cst_17 : f32 to vector<2x32xf32>
    %81 = arith.select %77, %79, %80 : vector<2x32xi1>, vector<2x32xf32>
    %82 = arith.addf %72, %81 : vector<2x32xf32>
    %83 = vector.extract_strided_slice %0 {offsets = [0, 1], sizes = [2, 1], strides = [1, 1]} : vector<2x2xi32> to vector<2x1xi32>
    %cst_18 = arith.constant 0.000000e+00 : f32
    %84 = vector.broadcast %cst_18 : f32 to vector<2x32xf32>
    %c0_19 = arith.constant 0 : index
    %c0_20 = arith.constant 0 : index
    %85 = vector.load %arg3[%c0_19, %c0_20] : memref<5x32xf32, #tpu.memory_space<vmem>>, vector<1x32xf32>
    %c0_i32_21 = arith.constant 0 : i32
    %86 = vector.broadcast %c0_i32_21 : i32 to vector<2x1xi32>
    %87 = arith.cmpi eq, %83, %86 : vector<2x1xi32>
    %cst_22 = arith.constant 0.000000e+00 : f32
    %88 = vector.shape_cast %87 : vector<2x1xi1> to vector<2x1xi1>
    %89 = vector.broadcast %88 : vector<2x1xi1> to vector<2x32xi1>
    %90 = vector.shape_cast %85 : vector<1x32xf32> to vector<1x32xf32>
    %91 = vector.broadcast %90 : vector<1x32xf32> to vector<2x32xf32>
    %92 = vector.broadcast %cst_22 : f32 to vector<2x32xf32>
    %93 = arith.select %89, %91, %92 : vector<2x32xi1>, vector<2x32xf32>
    %94 = arith.addf %84, %93 : vector<2x32xf32>
    %c1_23 = arith.constant 1 : index
    %c0_24 = arith.constant 0 : index
    %95 = vector.load %arg3[%c1_23, %c0_24] : memref<5x32xf32, #tpu.memory_space<vmem>>, vector<1x32xf32>
    %c1_i32_25 = arith.constant 1 : i32
    %96 = vector.broadcast %c1_i32_25 : i32 to vector<2x1xi32>
    %97 = arith.cmpi eq, %83, %96 : vector<2x1xi32>
    %cst_26 = arith.constant 0.000000e+00 : f32
    %98 = vector.shape_cast %97 : vector<2x1xi1> to vector<2x1xi1>
    %99 = vector.broadcast %98 : vector<2x1xi1> to vector<2x32xi1>
    %100 = vector.shape_cast %95 : vector<1x32xf32> to vector<1x32xf32>
    %101 = vector.broadcast %100 : vector<1x32xf32> to vector<2x32xf32>
    %102 = vector.broadcast %cst_26 : f32 to vector<2x32xf32>
    %103 = arith.select %99, %101, %102 : vector<2x32xi1>, vector<2x32xf32>
    %104 = arith.addf %94, %103 : vector<2x32xf32>
    %c2_27 = arith.constant 2 : index
    %c0_28 = arith.constant 0 : index
    %105 = vector.load %arg3[%c2_27, %c0_28] : memref<5x32xf32, #tpu.memory_space<vmem>>, vector<1x32xf32>
    %c2_i32_29 = arith.constant 2 : i32
    %106 = vector.broadcast %c2_i32_29 : i32 to vector<2x1xi32>
    %107 = arith.cmpi eq, %83, %106 : vector<2x1xi32>
    %cst_30 = arith.constant 0.000000e+00 : f32
    %108 = vector.shape_cast %107 : vector<2x1xi1> to vector<2x1xi1>
    %109 = vector.broadcast %108 : vector<2x1xi1> to vector<2x32xi1>
    %110 = vector.shape_cast %105 : vector<1x32xf32> to vector<1x32xf32>
    %111 = vector.broadcast %110 : vector<1x32xf32> to vector<2x32xf32>
    %112 = vector.broadcast %cst_30 : f32 to vector<2x32xf32>
    %113 = arith.select %109, %111, %112 : vector<2x32xi1>, vector<2x32xf32>
    %114 = arith.addf %104, %113 : vector<2x32xf32>
    %c3_31 = arith.constant 3 : index
    %c0_32 = arith.constant 0 : index
    %115 = vector.load %arg3[%c3_31, %c0_32] : memref<5x32xf32, #tpu.memory_space<vmem>>, vector<1x32xf32>
    %c3_i32_33 = arith.constant 3 : i32
    %116 = vector.broadcast %c3_i32_33 : i32 to vector<2x1xi32>
    %117 = arith.cmpi eq, %83, %116 : vector<2x1xi32>
    %cst_34 = arith.constant 0.000000e+00 : f32
    %118 = vector.shape_cast %117 : vector<2x1xi1> to vector<2x1xi1>
    %119 = vector.broadcast %118 : vector<2x1xi1> to vector<2x32xi1>
    %120 = vector.shape_cast %115 : vector<1x32xf32> to vector<1x32xf32>
    %121 = vector.broadcast %120 : vector<1x32xf32> to vector<2x32xf32>
    %122 = vector.broadcast %cst_34 : f32 to vector<2x32xf32>
    %123 = arith.select %119, %121, %122 : vector<2x32xi1>, vector<2x32xf32>
    %124 = arith.addf %114, %123 : vector<2x32xf32>
    %c4_35 = arith.constant 4 : index
    %c0_36 = arith.constant 0 : index
    %125 = vector.load %arg3[%c4_35, %c0_36] : memref<5x32xf32, #tpu.memory_space<vmem>>, vector<1x32xf32>
    %c4_i32_37 = arith.constant 4 : i32
    %126 = vector.broadcast %c4_i32_37 : i32 to vector<2x1xi32>
    %127 = arith.cmpi eq, %83, %126 : vector<2x1xi32>
    %cst_38 = arith.constant 0.000000e+00 : f32
    %128 = vector.shape_cast %127 : vector<2x1xi1> to vector<2x1xi1>
    %129 = vector.broadcast %128 : vector<2x1xi1> to vector<2x32xi1>
    %130 = vector.shape_cast %125 : vector<1x32xf32> to vector<1x32xf32>
    %131 = vector.broadcast %130 : vector<1x32xf32> to vector<2x32xf32>
    %132 = vector.broadcast %cst_38 : f32 to vector<2x32xf32>
    %133 = arith.select %129, %131, %132 : vector<2x32xi1>, vector<2x32xf32>
    %134 = arith.addf %124, %133 : vector<2x32xf32>
    %c0_39 = arith.constant 0 : index
    %c0_40 = arith.constant 0 : index
    %135 = vector.load %arg4[%c0_39, %c0_40] : memref<2x64xf32, #tpu.memory_space<vmem>>, vector<2x32xf32>
    tpu.vector_store %arg4[%c0_39, %c0_40], %82 {strides = array<i32>} : memref<2x64xf32, #tpu.memory_space<vmem>>, vector<2x32xf32>,
    %c0_41 = arith.constant 0 : index
    %c32 = arith.constant 32 : index
    %136 = vector.load %arg4[%c0_41, %c32] : memref<2x64xf32, #tpu.memory_space<vmem>>, vector<2x32xf32>
    tpu.vector_store %arg4[%c0_41, %c32], %134 {strides = array<i32>} : memref<2x64xf32, #tpu.memory_space<vmem>>, vector<2x32xf32>,
    return
  }
  func.func @transform_0(%arg0: i32) -> (i32, i32) {
    %c0_i32 = arith.constant 0 : i32
    %c0_i32_0 = arith.constant 0 : i32
    return %arg0, %c0_i32 : i32, i32
  }
  func.func @transform_1(%arg0: i32) -> (i32, i32) {
    %c0_i32 = arith.constant 0 : i32
    %c0_i32_0 = arith.constant 0 : i32
    %c0_i32_1 = arith.constant 0 : i32
    return %c0_i32, %c0_i32_0 : i32, i32
  }
  func.func @transform_2(%arg0: i32) -> (i32, i32) {
    %c0_i32 = arith.constant 0 : i32
    %c0_i32_0 = arith.constant 0 : i32
    %c0_i32_1 = arith.constant 0 : i32
    return %c0_i32, %c0_i32_0 : i32, i32
  }
  func.func @transform_3(%arg0: i32) -> (i32, i32) {
    %c0_i32 = arith.constant 0 : i32
    %c0_i32_0 = arith.constant 0 : i32
    return %arg0, %c0_i32 : i32, i32
  }
}

</mosaic_0001>

<bundles_post_ra>
// kernel: tpu_custom_call.1
= control target key start
LH: loop header
LB: loop body
LE: loop exit
PB: predicated region body
PF: predicated region fallthrough
CT: control target
= control target key end

     0   :  { %8 = vsyncpa [#allocation3], 0  ;;  %s428_s0 = inlined_call_operand.hbm [shape: s32[2,2], index: 0, kind: input, shape index: {}]   ;;  %s429_s1 = inlined_call_operand.hbm [shape: f32[8,32], index: 1, kind: input, shape index: {}]   ;;  %s430_s2 = inlined_call_operand.hbm [shape: f32[5,32], index: 2, kind: input, shape index: {}]   ;;  %s431_s3 = inlined_call_operand.hbm [shape: f32[2,64], index: 3, kind: output, shape index: {}]  }
   0x1   :  { %9 = vsyncpa [#allocation6], 0 }
   0x2   :  { %10 = vsyncpa [#allocation4], 0  ;;  %s353_s12 = smov [#allocation5]   ;;  %s354_s14 = smov [#allocation2]  }
   0x3   :  { %s27_s13 = sshll.u32 %s353_s12, 4  ;;  %s17_s15 = sshll.u32 %s354_s14, 4  ;;  %s28_s13 = int_to_ptr.vmem [resolvable:$true] %s27_s13  ;;  %s18_s15 = int_to_ptr.vmem [resolvable:$true] %s17_s15 }
   0x4   :  { %s259_s18 = scalar_lea.hbm %s429_s1, 128 }
   0x5   :  { %p260_p0 = scmp.ne.s32.totalorder %s429_s1, %s259_s18  ;;  %p263_p1 = scmp.lt.u32.totalorder %s259_s18, %s429_s1 }
   0x7   :  { %p265_p2 = pnand %p263_p1, %p260_p0 }
   0x9   :  { %268 = shalt.err (!%p265_p2)
}
   0xa   :  { %s269_s23 = scalar_lea.vmem %s28_s13, 128  ;;  %p274_p4 = scmp.lt.s32.totalorder %s28_s13, %s28_s13 }
   0xb   :  { %p270_p3 = scmp.ne.s32.totalorder %s28_s13, %s269_s23  ;;  %p275_p5 = scmp.lt.s32.totalorder %s269_s23, %s269_s23 }
   0xd   :  { %p276_p6 = por %p275_p5, %p274_p4 }
   0xf   :  { %p277_p7 = pnand %p276_p6, %p270_p3 }
  0x11   :  { %280 = shalt.err (!%p277_p7)
}
  0x12   :  { %30 = dma.hbm_to_vmem [thread:$0]  %s429_s1, 128, %s28_s13, [#allocation6]  }
  0x13   :  { %s281_s28 = scalar_lea.hbm %s428_s0, 32 }
  0x14   :  { %p282_p8 = scmp.ne.s32.totalorder %s428_s0, %s281_s28  ;;  %p285_p9 = scmp.lt.u32.totalorder %s281_s28, %s428_s0 }
  0x16   :  { %p287_p10 = pnand %p285_p9, %p282_p8 }
  0x18   :  { %290 = shalt.err (!%p287_p10)
}
  0x19   :  { %s291_s6 = scalar_lea.vmem %s18_s15, 32  ;;  %p296_p12 = scmp.lt.s32.totalorder %s18_s15, %s18_s15 }
  0x1a   :  { %p292_p11 = scmp.ne.s32.totalorder %s18_s15, %s291_s6  ;;  %p297_p13 = scmp.lt.s32.totalorder %s291_s6, %s291_s6 }
  0x1c   :  { %p298_p0 = por %p297_p13, %p296_p12 }
  0x1e   :  { %p299_p1 = pnand %p298_p0, %p292_p11 }
  0x20   :  { %302 = shalt.err (!%p299_p1)
}
  0x21   :  { %20 = dma.hbm_to_vmem [thread:$0]  %s428_s0, 32, %s18_s15, [#allocation3]  }
  0x22   :  { %s355_s8 = smov [#allocation7]   ;;  %s303_s12 = scalar_lea.hbm %s430_s2, 128 }
  0x23   :  { %s37_s9 = sshll.u32 %s355_s8, 4  ;;  %p304_p2 = scmp.ne.s32.totalorder %s430_s2, %s303_s12  ;;  %s38_s9 = int_to_ptr.vmem [resolvable:$true] %s37_s9 }
  0x24   :  { %p307_p3 = scmp.lt.u32.totalorder %s303_s12, %s430_s2 }
  0x26   :  { %p309_p4 = pnand %p307_p3, %p304_p2 }
  0x28   :  { %312 = shalt.err (!%p309_p4)
}
  0x29   :  { %s313_s18 = scalar_lea.vmem %s38_s9, 128  ;;  %p318_p6 = scmp.lt.s32.totalorder %s38_s9, %s38_s9 }
  0x2a   :  { %p314_p5 = scmp.ne.s32.totalorder %s38_s9, %s313_s18  ;;  %p319_p7 = scmp.lt.s32.totalorder %s313_s18, %s313_s18 }
  0x2c   :  { %p320_p8 = por %p319_p7, %p318_p6 }
  0x2e   :  { %p321_p9 = pnand %p320_p8, %p314_p5 }
  0x30   :  { %324 = shalt.err (!%p321_p9)
}
  0x31   :  { %40 = dma.hbm_to_vmem [thread:$0]  %s430_s2, 128, %s38_s9, [#allocation6]  }
  0x32   :  { %347 = dma.done.wait [#allocation3], 32  }
  0x33   :  { %348 = vsyncadd [#allocation3], 4294967264 }
  0x34   :  { %349 = dma.done.wait [#allocation6], 256  }
  0x35   :  { %350 = vsyncadd [#allocation6], 4294967040  ;;  %v356_v0 = vmov 1   ;;  %v50_v1 = vld [vmem:[#allocation2] sm:$0x3]  ;;  %v357_v2 = vmov 0  }
  0x36   :  { %255 = vset.pattern.permute.xlu1 %v356_v0  ;;  %254 = vset.pattern.permute.xlu0 %v356_v0  ;;  %vm78_vm0 = vcmp.eq.s32.totalorder %v50_v1, 2  ;;  %vm52_vm1 = vcmp.eq.s32.totalorder %v50_v1, 0  ;;  %vm91_vm2 = vcmp.eq.s32.totalorder %v50_v1, 3  ;;  %vm65_vm3 = vcmp.eq.s32.totalorder %v50_v1, 1  ;;  %v242_v13 = vld [vmem:[#allocation7] ss:$0 sm:$0xff] }
  0x37   :  { %v79_v3 = vsel %vm78_vm0, 1, %v357_v2  ;;  %v53_v4 = vsel %vm52_vm1, 1, %v357_v2  ;;  %v92_v5 = vsel %vm91_vm2, 1, %v357_v2  ;;  %v66_v6 = vsel %vm65_vm3, 1, %v357_v2  ;;  %v243_v14 = vld [vmem:[#allocation7 + $0x1] ss:$0 sm:$0xff] }
  0x38   :  { %179 = vperm.xlu1 %255, %v79_v3   ;;  %157 = vperm.xlu0 %254, %v53_v4   ;;  %vm104_vm4 = vcmp.eq.s32.totalorder %v50_v1, 4  ;;  %vm117_vm5 = vcmp.eq.s32.totalorder %v50_v1, 5  ;;  %vm130_vm6 = vcmp.eq.s32.totalorder %v50_v1, 6  ;;  %vm143_vm7 = vcmp.eq.s32.totalorder %v50_v1, 7  ;;  %v244_v17 = vld [vmem:[#allocation7 + $0x2] ss:$0 sm:$0xff] }
  0x39   :  { %v105_v7 = vsel %vm104_vm4, 1, %v357_v2  ;;  %v118_v8 = vsel %vm117_vm5, 1, %v357_v2  ;;  %v131_v9 = vsel %vm130_vm6, 1, %v357_v2  ;;  %v144_v10 = vsel %vm143_vm7, 1, %v357_v2  ;;  %v245_v20 = vld [vmem:[#allocation7 + $0x3] ss:$0 sm:$0xff] }
  0x3a   :  { %v246_v25 = vld [vmem:[#allocation7 + $0x4] ss:$0 sm:$0xff]  ;;  %v234_v28 = vld [vmem:[#allocation5] ss:$0 sm:$0xff]  ;;  %v236_v31 = vld [vmem:[#allocation5 + $0x2] ss:$0 sm:$0xff] }
  0x3b   :  { %v235_v32 = vld [vmem:[#allocation5 + $0x1] ss:$0 sm:$0xff]  ;;  %s358_s2 = smov 32   ;;  %v237_v40 = vld [vmem:[#allocation5 + $0x3] ss:$0 sm:$0xff]  ;;  %vm210_vm5 = vcmask 254976  }
  0x3c   :  { %190 = vperm.xlu1 %255, %v92_v5   ;;  %168 = vperm.xlu0 %254, %v66_v6   ;;  %v238_v41 = vld [vmem:[#allocation5 + $0x4] ss:$0 sm:$0xff]  ;;  %v239_v48 = vld [vmem:[#allocation5 + $0x5] ss:$0 sm:$0xff]  ;;  %v240_v49 = vld [vmem:[#allocation5 + $0x6] ss:$0 sm:$0xff] }
  0x3d   :  { %v241_v56 = vld [vmem:[#allocation5 + $0x7] ss:$0 sm:$0xff]  ;;  %s359_s19 = smov [#allocation8]   ;;  %vm216_vm6 = vcmask 517376  }
  0x3e   :  { %s224_s20 = sshll.u32 %s359_s19, 4  ;;  %s225_s20 = int_to_ptr.vmem [resolvable:$true] %s224_s20 }
  0x3f   :  { %s325_s21 = scalar_lea.vmem %s225_s20, 32  ;;  %p330_p11 = scmp.lt.s32.totalorder %s225_s20, %s225_s20 }
  0x40   :  { %201 = vperm.xlu0 %254, %v105_v7   ;;  %256 = vset.pattern.permute.xlu1 %v357_v2  ;;  %p326_p10 = scmp.ne.s32.totalorder %s225_s20, %s325_s21  ;;  %p331_p12 = scmp.lt.s32.totalorder %s325_s21, %s325_s21 }
  0x41   :  { %55 = vperm.xlu1 %256, %v53_v4  }
  0x42   :  { %p332_p13 = por %p331_p12, %p330_p11 }
  0x44   :  { %257 = vset.pattern.permute.xlu0 %v357_v2  ;;  %p333_p0 = pnand %p332_p13, %p326_p10 }
  0x45   :  { %81 = vperm.xlu1 %256, %v79_v3   ;;  %68 = vperm.xlu0 %257, %v66_v6  }
  0x49   :  { %94 = vperm.xlu1 %256, %v92_v5   ;;  %107 = vperm.xlu0 %257, %v105_v7  }
  0x4d   :  { %120 = vperm.xlu1 %256, %v118_v8   ;;  %133 = vperm.xlu0 %257, %v131_v9  }
  0x51   :  { %146 = vperm.xlu1 %256, %v144_v10   ;;  %258 = vset.pattern.permute.xlu0 %v356_v0 }
  0xb7   :  { %v180_v11 = vpop.permute.xlu1 %179  ;;  %v158_v12 = vpop.permute.xlu0 %157 }
  0xb8   :  { %vm159_vm8 = vcmp.eq.s32.totalorder %v158_v12, 1  ;;  %vm181_vm9 = vcmp.eq.s32.totalorder %v180_v11, 1 }
  0xb9   :  { %v164_v18 = vsel %vm159_vm8, %v242_v13, 0.0  ;;  %v186_v22 = vsel %vm181_vm9, %v244_v17, 0.0 }
  0xbb   :  { %v191_v15 = vpop.permute.xlu1 %190  ;;  %v169_v16 = vpop.permute.xlu0 %168 }
  0xbc   :  { %vm170_vm10 = vcmp.eq.s32.totalorder %v169_v16, 1  ;;  %vm192_vm11 = vcmp.eq.s32.totalorder %v191_v15, 1 }
  0xbd   :  { %v175_v19 = vsel %vm170_vm10, %v243_v14, 0.0  ;;  %v197_v27 = vsel %vm192_vm11, %v245_v20, 0.0 }
  0xbe   :  { %v176_v21 = vadd.f32 %v175_v19, %v164_v18 }
  0xbf   :  { %v202_v23 = vpop.permute.xlu0 %201 }
  0xc0   :  { %v187_v24 = vadd.f32 %v186_v22, %v176_v21  ;;  %vm203_vm12 = vcmp.eq.s32.totalorder %v202_v23, 1  ;;  %v56_v26 = vpop.permute.xlu1 %55 }
  0xc1   :  { %vm57_vm13 = vcmp.eq.s32.totalorder %v56_v26, 1  ;;  %v208_v30 = vsel %vm203_vm12, %v246_v25, 0.0 }
  0xc2   :  { %v198_v29 = vadd.f32 %v197_v27, %v187_v24  ;;  %v62_v34 = vsel %vm57_vm13, %v234_v28, 0.0 }
  0xc4   :  { %v209_v33 = vadd.f32 %v208_v30, %v198_v29  ;;  %v82_v35 = vpop.permute.xlu1 %81  ;;  %v69_v36 = vpop.permute.xlu0 %68 }
  0xc5   :  { %vm83_vm14 = vcmp.eq.s32.totalorder %v82_v35, 1  ;;  %vm70_vm15 = vcmp.eq.s32.totalorder %v69_v36, 1 }
  0xc6   :  { %213 = vrot.lane.b32.xlu0 %v209_v33, %s358_s2  ;;  %v88_v37 = vsel %vm83_vm14, %v236_v31, 0.0  ;;  %v75_v38 = vsel %vm70_vm15, %v235_v32, 0.0 }
  0xc7   :  { %v76_v39 = vadd.f32 %v75_v38, %v62_v34 }
  0xc8   :  { %v95_v42 = vpop.permute.xlu1 %94  ;;  %v108_v43 = vpop.permute.xlu0 %107 }
  0xc9   :  { %v89_v44 = vadd.f32 %v88_v37, %v76_v39  ;;  %vm96_vm0 = vcmp.eq.s32.totalorder %v95_v42, 1  ;;  %vm109_vm1 = vcmp.eq.s32.totalorder %v108_v43, 1 }
  0xca   :  { %v101_v45 = vsel %vm96_vm0, %v237_v40, 0.0  ;;  %v114_v46 = vsel %vm109_vm1, %v238_v41, 0.0 }
  0xcb   :  { %v102_v47 = vadd.f32 %v101_v45, %v89_v44 }
  0xcc   :  { %v121_v50 = vpop.permute.xlu1 %120  ;;  %v134_v51 = vpop.permute.xlu0 %133 }
  0xcd   :  { %v115_v52 = vadd.f32 %v114_v46, %v102_v47  ;;  %vm122_vm2 = vcmp.eq.s32.totalorder %v121_v50, 1  ;;  %vm135_vm3 = vcmp.eq.s32.totalorder %v134_v51, 1 }
  0xce   :  { %v127_v53 = vsel %vm122_vm2, %v239_v48, 0.0  ;;  %v140_v54 = vsel %vm135_vm3, %v240_v49, 0.0 }
  0xcf   :  { %v128_v55 = vadd.f32 %v127_v53, %v115_v52 }
  0xd0   :  { %v147_v57 = vpop.permute.xlu1 %146 }
  0xd1   :  { %v141_v58 = vadd.f32 %v140_v54, %v128_v55  ;;  %vm148_vm4 = vcmp.eq.s32.totalorder %v147_v57, 1 }
  0xd2   :  { %v153_v59 = vsel %vm148_vm4, %v241_v56, 0.0 }
  0xd3   :  { %v154_v60 = vadd.f32 %v153_v59, %v141_v58 }
  0xd5   :  { %211 = vst.msk [vmem:[#allocation8] sm:$0x3] %vm210_vm5, %v154_v60 }
 0x138   :  { %v214_v61 = vpop.permute.xlu0 %213 }
 0x139   :  { %217 = vst.msk [vmem:[#allocation8] sm:$0x3] %vm216_vm6, %v214_v61 }
 0x13a   :  { %336 = shalt.err (!%p333_p0)
}
 0x13b   :  { %s337_s24 = scalar_lea.hbm %s431_s3, 32 }
 0x13c   :  { %p338_p1 = scmp.ne.s32.totalorder %s431_s3, %s337_s24  ;;  %p341_p2 = scmp.lt.u32.totalorder %s337_s24, %s431_s3 }
 0x13e   :  { %p343_p3 = pnand %p341_p2, %p338_p1 }
 0x140   :  { %346 = shalt.err (!%p343_p3)
}
 0x141   :  { %227 = dma.vmem_to_hbm [thread:$0]  %s225_s20, 32, %s431_s3, [#allocation4]  }
 0x142   :  { %351 = dma.done.wait [#allocation4], 32  }
 0x143   :  { %352 = vsyncadd [#allocation4], 4294967264 }
 0x144   :  { %231 = vsyncpa [#allocation3], 1 }
 0x145   :  { %232 = vsyncpa [#allocation6], 1 }
 0x146   :  { %233 = vsyncpa [#allocation4], 1 }

</bundles_post_ra>
